<compile_context>
chip_gen: v6e
topology: v6e:2x2x1
jax: 0.10.0
libtpu: 0.0.40
codegen_flags: <defaults>
</compile_context>

<pallas_src>
import functools
import math

import jax
import jax.numpy as jnp
from jax import lax
from jax.experimental import pallas as pl
from jax.experimental.pallas import tpu as pltpu


def _semantic_loss_kernel(vf_ref, nt_ref, vconv_ref, ind_ref,
                          loss_ref, pos_ref, *, alpha, num_concepts):
    """One block of bt batch elements per grid step (M = bt * C torch rows).

    vf_ref    : (1, M, out_dim)  torch-relaid visual feats   (matmul dtype)
    nt_ref    : (C, E)           normalized text embeddings  (matmul dtype)
    vconv_ref : (out_dim, E)     v_e_converter               (matmul dtype)
    ind_ref   : (1, 1, M)        indicator vectors           (f32)
    loss_ref  : (1, 1, M)        semantic loss, lane-major   (f32)
    pos_ref   : (1, 1, M)        diagonal cosine sim, lane-major (f32)
    """
    C = num_concepts
    vf = vf_ref[0]                                                    # (M, D)
    nt = nt_ref[...]                                                  # (C, E)
    M = vf.shape[0]

    # Visual projection into the embedding space (single MXU matmul, f32 acc).
    emb_v = jnp.dot(vf, vconv_ref[...],
                    preferred_element_type=jnp.float32)               # (M, E)

    # F.normalize(p=2, dim=1) via rsqrt (EUP slot) instead of sqrt + divide.
    inv = lax.rsqrt(jnp.maximum(
        jnp.sum(emb_v * emb_v, axis=1, keepdims=True), 1e-24))
    nv = (emb_v * inv).astype(nt.dtype)                               # (M, E)

    # cos_t[j, m] = <nt_j, nv_m>; (C, M) orientation so the j-reduction lands
    # directly in a lane-dense (1, M) row.
    cos_t = lax.dot_general(nt, nv, (((1,), (1,)), ((), ())),
                            preferred_element_type=jnp.float32)       # (C, M)

    # Diagonal selection mask built in-kernel (no dmask DMA): mask[j, m] is
    # True iff (m % C) == j.  Off-diagonal terms add exact zeros, so the
    # masked sum equals cos_t[m % C, m] bitwise.
    row = lax.broadcasted_iota(jnp.int32, (C, M), 0)
    col = lax.broadcasted_iota(jnp.int32, (C, M), 1)
    is_diag = (col % C) == row
    diag = jnp.sum(jnp.where(is_diag, cos_t, 0.0),
                   axis=0, keepdims=True)                             # (1, M)

    # Hinge without the explicit -2*eye term: on the diagonal
    # alpha + cos - diag == alpha exactly, so the eye term reduces to the
    # compile-time scalar correction relu(alpha) - relu(alpha - 2).
    hinge = jnp.maximum(alpha + cos_t - diag, 0.0)                    # (C, M)
    corr = max(float(alpha), 0.0) - max(float(alpha) - 2.0, 0.0)
    loss = (jnp.sum(hinge, axis=0, keepdims=True) - corr) * ind_ref[0]

    loss_ref[0] = loss
    pos_ref[0] = diag


def _pick_block_batch(B, C, lane=128, target_rows=1024, max_pad_ratio=2):
    """Choose (block_batch, grid_steps, padded_batch).

    Targets M = bt*C as a multiple of 128 lanes (unmasked stores, filled MXU N
    dim), padding the batch when B's divisors don't cooperate, but gives up on
    lane density rather than padding the batch by more than ~max_pad_ratio.
    Keeps >= 2 grid steps when possible so the 'parallel' axis can span both
    v7x TensorCores (on v5e/v6e the extra step only costs ~0.35us).
    """
    if B * C <= lane:
        return B, 1, B                       # tiny problem: one step, no pad
    unit = lane // math.gcd(C, lane)         # minimal bt giving M % 128 == 0
    if -(-B // unit) * unit > max_pad_ratio * B:
        unit = 1                             # lane density too expensive here
    units_total = -(-B // unit)              # ceil(B / unit)
    units_per_step = max(1, min(max(1, target_rows // (unit * C)), units_total))
    if units_total >= 2:
        units_per_step = min(units_per_step, -(-units_total // 2))
    bt = units_per_step * unit
    steps = -(-units_total // units_per_step)
    return bt, steps, steps * bt


def semantic_loss_pallas(visual_feats, indicator_vectors, v_e_converter,
                         w_e_converter, word_vectors, alpha=1.0,
                         matmul_dtype=jnp.bfloat16, block_batch=None):
    B, C, H, W = visual_feats.shape
    out_dim = H * W
    text_dim, emb_dim = w_e_converter.shape
    assert v_e_converter.shape == (out_dim, emb_dim)
    assert word_vectors.shape == (C, text_dim)

    if block_batch is None:
        bt, steps, B_pad = _pick_block_batch(B, C)
    else:
        bt = int(block_batch)
        steps = -(-B // bt)
        B_pad = steps * bt
    M = bt * C

    # ---- batch-invariant text path: plain jnp (fused by XLA, no extra launch)
    wv32 = word_vectors.astype(jnp.float32)
    we32 = w_e_converter.astype(jnp.float32)
    emb_t = wv32 @ we32                                               # (C, E)
    nt = (emb_t * lax.rsqrt(jnp.maximum(
        jnp.sum(emb_t * emb_t, axis=1, keepdims=True), 1e-24)))
    nt = nt.astype(matmul_dtype)

    # ---- torch-compatible relayout of visual_feats.
    # reshape -> transpose(0,2,1) -> reshape reproduce torch's
    # reshape/transpose/reshape(-1, out_dim) exactly (row-major
    # reinterpretation included).  The reshapes are bitcasts, so this is ONE
    # transpose copy with the matmul-dtype cast fused into it.
    vf = visual_feats
    ind = indicator_vectors.astype(jnp.float32)
    if B_pad != B:
        # Zero-pad the batch: padded rows give cos == 0 and indicator == 0,
        # so their loss is 0 and both outputs are sliced back to B below.
        vf = jnp.pad(vf, ((0, B_pad - B), (0, 0), (0, 0), (0, 0)))
        ind = jnp.pad(ind, ((0, B_pad - B), (0, 0)))
    vf = jnp.transpose(jnp.reshape(vf, (B_pad, C, out_dim)), (0, 2, 1))
    vf4 = jnp.reshape(vf, (steps, M, out_dim)).astype(matmul_dtype)
    ind3 = jnp.reshape(ind, (steps, 1, M))

    kernel = functools.partial(_semantic_loss_kernel,
                               alpha=float(alpha), num_concepts=C)

    loss3, pos3 = pl.pallas_call(
        kernel,
        out_shape=(jax.ShapeDtypeStruct((steps, 1, M), jnp.float32),
                   jax.ShapeDtypeStruct((steps, 1, M), jnp.float32)),
        grid=(steps,),
        in_specs=[
            pl.BlockSpec((1, M, out_dim), lambda g: (g, 0, 0)),
            pl.BlockSpec((C, emb_dim), lambda g: (0, 0)),
            pl.BlockSpec((out_dim, emb_dim), lambda g: (0, 0)),
            pl.BlockSpec((1, 1, M), lambda g: (g, 0, 0)),
        ],
        out_specs=(
            pl.BlockSpec((1, 1, M), lambda g: (g, 0, 0)),
            pl.BlockSpec((1, 1, M), lambda g: (g, 0, 0)),
        ),
        compiler_params=pltpu.CompilerParams(
            dimension_semantics=("parallel",)),
    )(vf4, nt, v_e_converter.astype(matmul_dtype), ind3)

    loss = jnp.reshape(loss3, (B_pad, C))[:B]
    positive = jnp.reshape(pos3, (B_pad, C))[:B]
    return loss, positive


def semantic_loss_ref(visual_feats, indicator_vectors, v_e_converter,
                      w_e_converter, word_vectors, alpha=1.0):
    """Pure-JAX mirror of the PyTorch forward, for validation."""
    B, C, H, W = visual_feats.shape
    out_dim = H * W
    vf = jnp.reshape(
        jnp.transpose(jnp.reshape(visual_feats, (-1, C, out_dim)), (0, 2, 1)),
        (-1, out_dim))
    emb_v = vf @ v_e_converter
    emb_t = word_vectors @ w_e_converter
    nv = emb_v / jnp.maximum(
        jnp.linalg.norm(emb_v, axis=1, keepdims=True), 1e-12)
    nt = emb_t / jnp.maximum(
        jnp.linalg.norm(emb_t, axis=1, keepdims=True), 1e-12)
    cos = nv @ nt.T
    cos3 = jnp.reshape(cos, (-1, C, C))
    eye = jnp.eye(C, dtype=jnp.float32)
    positive = jnp.sum(cos3 * eye, axis=2)
    metric_p = positive[:, :, None]
    delta = cos3 - metric_p
    loss = jnp.sum(jax.nn.relu(alpha + delta - 2.0 * eye), axis=2)
    loss = loss * indicator_vectors
    return loss, positive


def _make_inputs(key, B, C, H, W, emb_dim, text_dim):
    out_dim = H * W
    k1, k2, k3, k4, k5 = jax.random.split(key, 5)
    visual_feats = jax.random.normal(k1, (B, C, H, W), jnp.float32)
    indicator_vectors = jax.random.bernoulli(k2, 0.5, (B, C)).astype(jnp.float32)
    # Deterministic "randn" parameter init (mirrors nn.Parameter(torch.randn(...)))
    v_e_converter = jax.random.normal(k3, (out_dim, emb_dim), jnp.float32)
    w_e_converter = jax.random.normal(k4, (text_dim, emb_dim), jnp.float32)
    word_vectors = jax.random.normal(k5, (C, text_dim), jnp.float32)
    return visual_feats, indicator_vectors, v_e_converter, w_e_converter, word_vectors


if __name__ == "__main__":
    key = jax.random.PRNGKey(0)
    ka, kb = jax.random.split(key)
    alpha = 1.0

    # ---- case 1: tiny (B*C <= 128) -> single grid step, no padding ---------
    B, C, H, W = 4, 8, 4, 4
    args = _make_inputs(ka, B, C, H, W, emb_dim=32, text_dim=8)
    ref_loss, ref_pos = semantic_loss_ref(*args, alpha=alpha)

    # Strict numerical check with f32 MXU operands (same math, same kernel).
    loss32, pos32 = semantic_loss_pallas(*args, alpha=alpha,
                                         matmul_dtype=jnp.float32)
    jax.block_until_ready((loss32, pos32))
    assert loss32.shape == (B, C) and pos32.shape == (B, C)
    assert jnp.allclose(loss32, ref_loss, atol=2e-3, rtol=2e-3)
    assert jnp.allclose(pos32, ref_pos, atol=2e-3, rtol=2e-3)

    # Production path: bf16 MXU operands (f32 accumulation, f32 hinge math).
    loss_bf, pos_bf = semantic_loss_pallas(*args, alpha=alpha)
    jax.block_until_ready((loss_bf, pos_bf))
    assert loss_bf.shape == (B, C) and pos_bf.shape == (B, C)
    assert jnp.allclose(pos_bf, ref_pos, atol=5e-2, rtol=5e-2)
    assert jnp.allclose(loss_bf, ref_loss, atol=1e-1, rtol=5e-2)

    # ---- case 2: padded / lane-dense path (B=20 -> bt=16, steps=2, M=256) --
    B2, C2, H2, W2 = 20, 16, 4, 4
    args2 = _make_inputs(kb, B2, C2, H2, W2, emb_dim=64, text_dim=8)
    ref_loss2, ref_pos2 = semantic_loss_ref(*args2, alpha=alpha)

    loss2, pos2 = semantic_loss_pallas(*args2, alpha=alpha,
                                       matmul_dtype=jnp.float32)
    jax.block_until_ready((loss2, pos2))
    assert loss2.shape == (B2, C2) and pos2.shape == (B2, C2)
    assert jnp.allclose(loss2, ref_loss2, atol=2e-3, rtol=2e-3)
    assert jnp.allclose(pos2, ref_pos2, atol=2e-3, rtol=2e-3)

    print("KERNEL_OK")
</pallas_src>

<mosaic_0001>
module attributes {stable_mosaic.version = 11 : i64} {
  func.func @_semantic_loss_kernel(%arg0: i32, %arg1: memref<1x32x16xf32, #tpu.memory_space<vmem>>, %arg2: memref<8x32xf32, #tpu.memory_space<vmem>>, %arg3: memref<16x32xf32, #tpu.memory_space<vmem>>, %arg4: memref<1x1x32xf32, #tpu.memory_space<vmem>>, %arg5: memref<1x1x32xf32, #tpu.memory_space<vmem>>, %arg6: memref<1x1x32xf32, #tpu.memory_space<vmem>>) attributes {dimension_semantics = [#tpu.dimension_semantics<parallel>], iteration_bounds = array<i64: 1>, scalar_prefetch = 0 : i64, scratch_operands = 0 : i64, tpu.core_type = #tpu.core_type<tc>, window_params = [{transform_indices = @transform_0, window_bounds = array<i64: 1, 32, 16>}, {pipeline_mode = #tpu.pipeline_mode<synchronous>, transform_indices = @transform_1, window_bounds = array<i64: 8, 32>}, {pipeline_mode = #tpu.pipeline_mode<synchronous>, transform_indices = @transform_2, window_bounds = array<i64: 16, 32>}, {transform_indices = @transform_3, window_bounds = array<i64: 1, 1, 32>}, {transform_indices = @transform_4, window_bounds = array<i64: 1, 1, 32>}, {transform_indices = @transform_5, window_bounds = array<i64: 1, 1, 32>}]} {
    %c0 = arith.constant 0 : index
    %c0_0 = arith.constant 0 : index
    %c0_1 = arith.constant 0 : index
    %0 = vector.load %arg1[%c0, %c0_0, %c0_1] : memref<1x32x16xf32, #tpu.memory_space<vmem>>, vector<1x32x16xf32>
    %1 = vector.shape_cast %0 : vector<1x32x16xf32> to vector<32x16xf32>
    %c0_2 = arith.constant 0 : index
    %c0_3 = arith.constant 0 : index
    %2 = vector.load %arg2[%c0_2, %c0_3] : memref<8x32xf32, #tpu.memory_space<vmem>>, vector<8x32xf32>
    %c0_4 = arith.constant 0 : index
    %c0_5 = arith.constant 0 : index
    %3 = vector.load %arg3[%c0_4, %c0_5] : memref<16x32xf32, #tpu.memory_space<vmem>>, vector<16x32xf32>
    %cst = arith.constant dense<0.000000e+00> : vector<32x32xf32>
    %4 = tpu.matmul %1, %3, %cst {dimension_numbers = #tpu.dot_dimension_numbers<[1], [0], [0], [1], [0, 0, 1, 1], [], []>} : vector<32x16xf32>, vector<16x32xf32>, vector<32x32xf32> -> vector<32x32xf32>
    %5 = arith.mulf %4, %4 : vector<32x32xf32>
    %cst_6 = arith.constant dense<0.000000e+00> : vector<32xf32>
    %6 = vector.multi_reduction <add>, %5, %cst_6 [1] : vector<32x32xf32> to vector<32xf32>
    %7 = vector.shape_cast %6 : vector<32xf32> to vector<32x1xf32>
    %cst_7 = arith.constant 1.000000e-24 : f32
    %8 = vector.broadcast %cst_7 : f32 to vector<32x1xf32>
    %9 = arith.maximumf %7, %8 : vector<32x1xf32>
    %10 = math.rsqrt %9 : vector<32x1xf32>
    %11 = vector.broadcast %10 : vector<32x1xf32> to vector<32x32xf32>
    %12 = arith.mulf %4, %11 : vector<32x32xf32>
    %cst_8 = arith.constant dense<0.000000e+00> : vector<8x32xf32>
    %13 = tpu.matmul %2, %12, %cst_8 {dimension_numbers = #tpu.dot_dimension_numbers<[1], [1], [0], [0], [0, 0, 1, 0], [], []>} : vector<8x32xf32>, vector<32x32xf32>, vector<8x32xf32> -> vector<8x32xf32>
    %14 = tpu.iota {dimensions = array<i32: 0>} : vector<8x32xi32>
    %15 = tpu.iota {dimensions = array<i32: 1>} : vector<8x32xi32>
    %c8_i32 = arith.constant 8 : i32
    %c0_i32 = arith.constant 0 : i32
    %16 = arith.cmpi eq, %c8_i32, %c0_i32 : i32
    %c1_i32 = arith.constant 1 : i32
    %17 = arith.select %16, %c1_i32, %c8_i32 : i32
    %18 = vector.broadcast %17 : i32 to vector<8x32xi32>
    %19 = arith.remsi %15, %18 : vector<8x32xi32>
    %c0_i32_9 = arith.constant 0 : i32
    %20 = vector.broadcast %c0_i32_9 : i32 to vector<8x32xi32>
    %21 = arith.cmpi ne, %19, %20 : vector<8x32xi32>
    %c0_i32_10 = arith.constant 0 : i32
    %22 = vector.broadcast %c0_i32_10 : i32 to vector<8x32xi32>
    %23 = arith.cmpi slt, %19, %22 : vector<8x32xi32>
    %c0_i32_11 = arith.constant 0 : i32
    %24 = arith.cmpi slt, %17, %c0_i32_11 : i32
    %25 = vector.broadcast %24 : i1 to vector<8x32xi1>
    %26 = vector.broadcast %25 : vector<8x32xi1> to vector<8x32xi1>
    %27 = arith.xori %23, %26 : vector<8x32xi1>
    %28 = arith.andi %27, %21 : vector<8x32xi1>
    %29 = vector.broadcast %17 : i32 to vector<8x32xi32>
    %30 = arith.addi %19, %29 : vector<8x32xi32>
    %31 = arith.select %28, %30, %19 : vector<8x32xi1>, vector<8x32xi32>
    %32 = arith.cmpi eq, %31, %14 : vector<8x32xi32>
    %cst_12 = arith.constant 0.000000e+00 : f32
    %33 = vector.broadcast %cst_12 : f32 to vector<8x32xf32>
    %34 = arith.select %32, %13, %33 : vector<8x32xi1>, vector<8x32xf32>
    %cst_13 = arith.constant dense<0.000000e+00> : vector<32xf32>
    %35 = vector.multi_reduction <add>, %34, %cst_13 [0] : vector<8x32xf32> to vector<32xf32>
    %36 = vector.shape_cast %35 : vector<32xf32> to vector<1x32xf32>
    %cst_14 = arith.constant 1.000000e+00 : f32
    %37 = vector.broadcast %cst_14 : f32 to vector<8x32xf32>
    %38 = arith.addf %37, %13 : vector<8x32xf32>
    %39 = vector.broadcast %36 : vector<1x32xf32> to vector<8x32xf32>
    %40 = arith.subf %38, %39 : vector<8x32xf32>
    %cst_15 = arith.constant 0.000000e+00 : f32
    %41 = vector.broadcast %cst_15 : f32 to vector<8x32xf32>
    %42 = arith.maximumf %40, %41 : vector<8x32xf32>
    %cst_16 = arith.constant dense<0.000000e+00> : vector<32xf32>
    %43 = vector.multi_reduction <add>, %42, %cst_16 [0] : vector<8x32xf32> to vector<32xf32>
    %44 = vector.shape_cast %43 : vector<32xf32> to vector<1x32xf32>
    %cst_17 = arith.constant 1.000000e+00 : f32
    %45 = vector.broadcast %cst_17 : f32 to vector<1x32xf32>
    %46 = arith.subf %44, %45 : vector<1x32xf32>
    %c0_18 = arith.constant 0 : index
    %c0_19 = arith.constant 0 : index
    %c0_20 = arith.constant 0 : index
    %47 = vector.load %arg4[%c0_18, %c0_19, %c0_20] : memref<1x1x32xf32, #tpu.memory_space<vmem>>, vector<1x1x32xf32>
    %48 = vector.shape_cast %47 : vector<1x1x32xf32> to vector<1x32xf32>
    %49 = arith.mulf %46, %48 : vector<1x32xf32>
    %c0_21 = arith.constant 0 : index
    %c0_22 = arith.constant 0 : index
    %c0_23 = arith.constant 0 : index
    %50 = vector.load %arg5[%c0_21, %c0_22, %c0_23] : memref<1x1x32xf32, #tpu.memory_space<vmem>>, vector<1x1x32xf32>
    %51 = vector.shape_cast %50 : vector<1x1x32xf32> to vector<1x32xf32>
    %52 = vector.shape_cast %49 : vector<1x32xf32> to vector<1x1x32xf32>
    tpu.vector_store %arg5[%c0_21, %c0_22, %c0_23], %52 {strides = array<i32>} : memref<1x1x32xf32, #tpu.memory_space<vmem>>, vector<1x1x32xf32>,
    %c0_24 = arith.constant 0 : index
    %c0_25 = arith.constant 0 : index
    %c0_26 = arith.constant 0 : index
    %53 = vector.load %arg6[%c0_24, %c0_25, %c0_26] : memref<1x1x32xf32, #tpu.memory_space<vmem>>, vector<1x1x32xf32>
    %54 = vector.shape_cast %53 : vector<1x1x32xf32> to vector<1x32xf32>
    %55 = vector.shape_cast %36 : vector<1x32xf32> to vector<1x1x32xf32>
    tpu.vector_store %arg6[%c0_24, %c0_25, %c0_26], %55 {strides = array<i32>} : memref<1x1x32xf32, #tpu.memory_space<vmem>>, vector<1x1x32xf32>,
    return
  }
  func.func @transform_0(%arg0: i32) -> (i32, i32, i32) {
    %c0_i32 = arith.constant 0 : i32
    %c0_i32_0 = arith.constant 0 : i32
    %c0_i32_1 = arith.constant 0 : i32
    return %arg0, %c0_i32, %c0_i32_0 : i32, i32, i32
  }
  func.func @transform_1(%arg0: i32) -> (i32, i32) {
    %c0_i32 = arith.constant 0 : i32
    %c0_i32_0 = arith.constant 0 : i32
    %c0_i32_1 = arith.constant 0 : i32
    return %c0_i32, %c0_i32_0 : i32, i32
  }
  func.func @transform_2(%arg0: i32) -> (i32, i32) {
    %c0_i32 = arith.constant 0 : i32
    %c0_i32_0 = arith.constant 0 : i32
    %c0_i32_1 = arith.constant 0 : i32
    return %c0_i32, %c0_i32_0 : i32, i32
  }
  func.func @transform_3(%arg0: i32) -> (i32, i32, i32) {
    %c0_i32 = arith.constant 0 : i32
    %c0_i32_0 = arith.constant 0 : i32
    %c0_i32_1 = arith.constant 0 : i32
    return %arg0, %c0_i32, %c0_i32_0 : i32, i32, i32
  }
  func.func @transform_4(%arg0: i32) -> (i32, i32, i32) {
    %c0_i32 = arith.constant 0 : i32
    %c0_i32_0 = arith.constant 0 : i32
    %c0_i32_1 = arith.constant 0 : i32
    return %arg0, %c0_i32, %c0_i32_0 : i32, i32, i32
  }
  func.func @transform_5(%arg0: i32) -> (i32, i32, i32) {
    %c0_i32 = arith.constant 0 : i32
    %c0_i32_0 = arith.constant 0 : i32
    %c0_i32_1 = arith.constant 0 : i32
    return %arg0, %c0_i32, %c0_i32_0 : i32, i32, i32
  }
}

</mosaic_0001>

<bundles_post_ra>
// kernel: tpu_custom_call.1
= control target key start
LH: loop header
LB: loop body
LE: loop exit
PB: predicated region body
PF: predicated region fallthrough
CT: control target
= control target key end

     0   :  { %11 = vsyncpa [#allocation3], 0  ;;  %vm28_vm0 = vcmask 130048   ;;  %s484_s0 = inlined_call_operand.vmem [shape: f32[1,32,16], index: 0, kind: input, shape index: {}]   ;;  %s485_s1 = inlined_call_operand.vmem [shape: f32[8,32], index: 1, kind: input, shape index: {}]   ;;  %s486_s2 = inlined_call_operand.vmem [shape: f32[16,32], index: 2, kind: input, shape index: {}]   ;;  %s487_s3 = inlined_call_operand.vmem [shape: f32[1,1,32], index: 3, kind: input, shape index: {}]   ;;  %s488_s4 = inlined_call_operand.hbm [shape: f32[1,1,32], index: 4, kind: output, shape index: {0}]   ;;  %s489_s5 = inlined_call_operand.hbm [shape: f32[1,1,32], index: 5, kind: output, shape index: {1}]  }
   0x1   :  { %v27_v0 = vld [vmem:[%s486_s2 + $0x8] sm:$0xff]  ;;  %v26_v1 = vld [vmem:[%s486_s2] sm:$0xff] }
   0x2   :  { %v21_v2 = vld [vmem:[%s484_s0] sm:$0xff]  ;;  %330 = vmatprep.subr.mxu0 %v27_v0  ;;  %v22_v3 = vld [vmem:[%s484_s0 + $0x8] sm:$0xff] }
   0x3   :  { %334 = vmatprep.mubr.msk.f32.mxu0 %vm28_vm0, %v21_v2  ;;  %331 = vmatpush3.msra.mxu0 %v27_v0 }
   0x4   :  { %12 = vsyncpa [#allocation5], 0  ;;  %332 = vmatprep.subr.mxu0 %v26_v1  ;;  %v23_v4 = vld [vmem:[%s484_s0 + $0x10] sm:$0xff]  ;;  %v24_v5 = vld [vmem:[%s484_s0 + $0x18] sm:$0xff]  ;;  %vm130_vm1 = vcmask 261120   ;;  %v407_v18 = vmov 0.0   ;;  %v240_v36 = vlaneseq }
   0x5   :  { %333 = vmatpush3.msra.mxu0 %v26_v1  ;;  %340 = vmatprep.subr.mxu1 %v407_v18  ;;  %vm408_vm2 = vmmov 0   ;;  %v25_v35 = vld [vmem:[%s485_s1] sm:$0xff]  ;;  %s409_s30 = smov [#allocation4]   ;;  %vm278_vm4 = vcmask 253952  }
   0x6   :  { %335 = vmatmul.mubr.msk.f32.vlgmr.msra.gmra.mxu0 %vm28_vm0, %v22_v3  ;;  %348 = vmatprep.mubr.msk.f32.mxu1 %vm408_vm2, %v407_v18  ;;  %v243_v37 = vand.u32 127, %v240_v36  ;;  %v241_v38 = vshrl.u32 %v240_v36, 7  ;;  %s297_s6 = sshll.u32 %s409_s30, 4  ;;  %s298_s6 = int_to_ptr.vmem [resolvable:$true] %s297_s6 }
   0x7   :  { %337 = vmatprep.mubr.msk.f32.mxu0 %vm28_vm0, %v23_v4  ;;  %s363_s1 = scalar_lea.vmem %s298_s6, 16  ;;  %s367_s7 = scalar_lea.vmem %s298_s6, 32 }
   0x8   :  { %v248_v39 = vand.u32 7, %v243_v37  ;;  %p364_p0 = scmp.ne.s32.totalorder %s298_s6, %s363_s1  ;;  %p368_p1 = scmp.lt.s32.totalorder %s298_s6, %s298_s6 }
   0x9   :  { %p369_p2 = scmp.lt.s32.totalorder %s367_s7, %s363_s1 }
   0xa   :  { %338 = vmatmul.mubr.msk.f32.gmra.mxu0 %vm28_vm0, %v24_v5  ;;  %vm256_vm3 = vcmp.eq.s32.totalorder %v248_v39, %v241_v38 }
   0xb   :  { %p370_p3 = por %p369_p2, %p368_p1 }
   0xd   :  { %p371_p4 = pnand %p370_p3, %p364_p0 }
  0xc6   :  { %v336_v6 = vpop.f32.mrf.mxu0 }
  0xc7   :  { %v127_v7 = vmul.f32 %v336_v6, %v336_v6 }
  0xc8   :  { %v107_v8 = vpop.f32.mrf.mxu0 }
  0xc9   :  { %v126_v9 = vmul.f32 %v107_v8, %v107_v8  ;;  %v134_v10 = vsel %vm130_vm1, %v127_v7, 0.0 }
  0xca   :  { %135 = vadd.xlane.f32.xlu1 %v134_v10  ;;  %v339_v11 = vpop.f32.mrf.mxu0 }
  0xcb   :  { %v129_v12 = vmul.f32 %v339_v11, %v339_v11  ;;  %v131_v15 = vsel %vm130_vm1, %v126_v9, 0.0 }
  0xcc   :  { %v117_v13 = vpop.f32.mrf.mxu0 }
  0xcd   :  { %v128_v14 = vmul.f32 %v117_v13, %v117_v13  ;;  %v140_v16 = vsel %vm130_vm1, %v129_v12, 0.0 }
  0xce   :  { %132 = vadd.xlane.f32.xlu1 %v131_v15  ;;  %141 = vadd.xlane.f32.xlu0 %v140_v16 }
  0xcf   :  { %v137_v17 = vsel %vm130_vm1, %v128_v14, 0.0 }
  0xd2   :  { %138 = vadd.xlane.f32.xlu0 %v137_v17 }
 0x153   :  { %v136_v20 = vpop.xlane.xlu1 %135 }
 0x154   :  { %v144_v24 = vmax.f32 %v136_v20, 1e-24 }
 0x157   :  { %v142_v19 = vpop.xlane.xlu0 %141  ;;  %v133_v25 = vpop.xlane.xlu1 %132 }
 0x158   :  { %v146_v21 = vmax.f32 %v142_v19, 1e-24  ;;  %v143_v26 = vmax.f32 %v133_v25, 1e-24 }
 0x15a   :  { %355 = vrsqrt.f32 %v146_v21 }
 0x15b   :  { %v139_v22 = vpop.xlane.xlu0 %138 }
 0x15c   :  { %v145_v23 = vmax.f32 %v139_v22, 1e-24 }
 0x15e   :  { %357 = vrsqrt.f32 %v145_v23 }
 0x15f   :  { %359 = vrsqrt.f32 %v144_v24 }
 0x160   :  { %361 = vrsqrt.f32 %v143_v26 }
 0x167   :  { %v356_v27 = vpop.eup %355 }
 0x168   :  { %v154_v28 = vmul.f32 %v356_v27, %v339_v11 }
 0x16a   :  { %341 = vmatpush3.xpose.msk.msra.mxu1 %vm130_vm1, %v154_v28 }
 0x16b   :  { %v358_v29 = vpop.eup %357  ;;  %342 = vmatprep.subr.mxu1 %v407_v18 }
 0x16c   :  { %v153_v30 = vmul.f32 %v358_v29, %v117_v13  ;;  %v360_v31 = vpop.eup %359 }
 0x16d   :  { %v152_v32 = vmul.f32 %v360_v31, %v336_v6  ;;  %v362_v33 = vpop.eup %361 }
 0x16e   :  { %343 = vmatpush3.xpose.msk.msra.mxu1 %vm130_vm1, %v153_v30  ;;  %v151_v34 = vmul.f32 %v362_v33, %v107_v8 }
 0x16f   :  { %344 = vmatprep.subr.mxu1 %v407_v18 }
 0x172   :  { %345 = vmatpush3.xpose.msk.msra.mxu1 %vm130_vm1, %v152_v32 }
 0x173   :  { %346 = vmatprep.subr.mxu1 %v407_v18 }
 0x176   :  { %347 = vmatpush3.xpose.msk.msra.mxu1 %vm130_vm1, %v151_v34 }
 0x179   :  { %349 = vmatmul.mubr.msk.f32.vlgmr.msra.gmra.mxu1 %vm130_vm1, %v25_v35 }
 0x239   :  { %v236_v40 = vpop.f32.mrf.mxu1 }
 0x23a   :  { %v257_v41 = vsel %vm256_vm3, %v236_v40, 0.0  ;;  %v265_v50 = vadd.f32 1.0, %v236_v40 }
 0x23b   :  { %v258_v42 = vsel %vm130_vm1, %v257_v41, 0.0  ;;  %v350_v43 = vpop.f32.mrf.mxu1 }
 0x23c   :  { %v259_v44 = vrot.slane %v258_v42, 4 }
 0x23e   :  { %v260_v45 = vadd.f32 %v259_v44, %v258_v42 }
 0x240   :  { %v261_v46 = vrot.slane %v260_v45, 2 }
 0x242   :  { %v262_v47 = vadd.f32 %v261_v46, %v260_v45 }
 0x244   :  { %v263_v48 = vrot.slane %v262_v47, 1 }
 0x246   :  { %v264_v49 = vadd.f32 %v263_v48, %v262_v47 }
 0x248   :  { %v266_v51 = vsub.f32 %v265_v50, %v264_v49  ;;  %280 = vst.msk [vmem:[#allocation4] sm:$0x1] %vm278_vm4, %v264_v49 }
 0x249   :  { %374 = shalt.err (!%p371_p4)
}
 0x24a   :  { %300 = dma.vmem_to_hbm [thread:$0]  %s298_s6, 16, %s489_s5, [#allocation5]   ;;  %v267_v52 = vmax.f32 %v266_v51, 0.0  ;;  %v276_v60 = vld [vmem:[%s487_s3] sm:$0x1] }
 0x24b   :  { %s410_s12 = smov [#allocation2]  }
 0x24c   :  { %v268_v53 = vsel %vm130_vm1, %v267_v52, 0.0  ;;  %s287_s13 = sshll.u32 %s410_s12, 4  ;;  %s288_s13 = int_to_ptr.vmem [resolvable:$true] %s287_s13 }
 0x24d   :  { %v269_v54 = vrot.slane %v268_v53, 4  ;;  %s383_s5 = scalar_lea.vmem %s288_s13, 16  ;;  %s387_s14 = scalar_lea.vmem %s288_s13, 32 }
 0x24e   :  { %p384_p5 = scmp.ne.s32.totalorder %s288_s13, %s383_s5  ;;  %p388_p6 = scmp.lt.s32.totalorder %s288_s13, %s288_s13 }
 0x24f   :  { %v270_v55 = vadd.f32 %v269_v54, %v268_v53  ;;  %p389_p7 = scmp.lt.s32.totalorder %s387_s14, %s383_s5 }
 0x251   :  { %v271_v56 = vrot.slane %v270_v55, 2  ;;  %p390_p8 = por %p389_p7, %p388_p6 }
 0x253   :  { %v272_v57 = vadd.f32 %v271_v56, %v270_v55  ;;  %p391_p9 = pnand %p390_p8, %p384_p5 }
 0x255   :  { %v273_v58 = vrot.slane %v272_v57, 1 }
 0x257   :  { %v274_v59 = vadd.f32 %v273_v58, %v272_v57 }
 0x259   :  { %v318_v61 = vadd.f32 -1.0, %v274_v59 }
 0x25b   :  { %v277_v62 = vmul.f32 %v318_v61, %v276_v60 }
 0x25d   :  { %279 = vst.msk [vmem:[#allocation2] sm:$0x1] %vm278_vm4, %v277_v62 }
 0x25e   :  { %394 = shalt.err (!%p391_p9)
}
 0x25f   :  { %290 = dma.vmem_to_hbm [thread:$0]  %s288_s13, 16, %s488_s4, [#allocation3]  }
 0x260   :  { %403 = dma.done.wait [#allocation3], 16  }
 0x261   :  { %404 = vsyncadd [#allocation3], 4294967280 }
 0x262   :  { %405 = dma.done.wait [#allocation5], 16  }
 0x263   :  { %406 = vsyncadd [#allocation5], 4294967280 }
 0x264   :  { %307 = vsyncpa [#allocation3], 1 }
 0x265   :  { %308 = vsyncpa [#allocation5], 1 }

</bundles_post_ra>
